<compile_context>
chip_gen: v6e
topology: v6e:2x2x1
jax: 0.10.0
libtpu: 0.0.40
codegen_flags: <defaults>
</compile_context>

<pallas_src>
import functools

import numpy as np
import jax
import jax.numpy as jnp
from jax.experimental import pallas as pl
from jax.experimental.pallas import tpu as pltpu


_TARGET_BLOCK_BYTES = 2 * 1024 * 1024   # per-array VMEM block target (~2 MiB)
_FOLD_LANE_TARGET = 1024                # fold rows into lanes when T is small


def _tri_kernel(flag_ref, d1_ref, d2_ref, x_ref, y_ref, *, mic_itval):
    """Elementwise triangulation on one [tile_rows, cols] block."""
    deg2rad = jnp.float32(np.pi / 180.0)
    # Global `(doa1 == doa2).any()` branch: +1 degree applied uniformly,
    # fused here from an SMEM scalar (no modified d1 copy ever hits HBM).
    d1 = (d1_ref[...] + flag_ref[0, 0]) * deg2rad
    d2 = d2_ref[...] * deg2rad

    s1 = jnp.sin(d1)
    c1 = jnp.cos(d1)
    s2 = jnp.sin(d2)
    c2 = jnp.cos(d2)
    # sin(d1 - d2) via the angle-difference identity: only two distinct trig
    # arguments instead of three.
    denom = s1 * c2 - c1 * s2 + jnp.float32(1e-8)

    # Exact divide (NOT pl.reciprocal(approx=True)): the approx reciprocal's
    # ~1e-3 relative error caused the previous correctness failure.
    side = s2 * jnp.float32(mic_itval) / denom
    side = jnp.clip(side, jnp.float32(50.0), jnp.float32(800.0))

    x_ref[...] = -side * c1
    y_ref[...] = side * s1


def _fold_factor(n_rows, n_cols):
    """Largest divisor k of n_rows with k * n_cols <= _FOLD_LANE_TARGET.

    Folding k rows into the lane dimension is a free (contiguous, row-major)
    reshape that keeps the kernel's last dim lane-dense when T is small,
    with no padding and no staging copy.
    """
    if n_cols >= _FOLD_LANE_TARGET // 2 or n_rows <= 1:
        return 1
    k_max = min(n_rows, max(1, _FOLD_LANE_TARGET // n_cols))
    for k in range(k_max, 0, -1):
        if n_rows % k == 0:
            return k
    return 1


def _row_tile(n_rows, row_bytes):
    """Rows per block: multiple of 8 (or the full extent), ~<= 2 MiB per
    array, and >= 2 blocks whenever there are >= 16 rows so v7x's two
    TensorCores (sharded over the 'parallel' grid axis) are both busy."""
    if n_rows < 16:
        return n_rows                                    # single full-extent block
    max_rows = max(8, (_TARGET_BLOCK_BYTES // row_bytes) // 8 * 8)
    n_blocks = max(2, pl.cdiv(n_rows, max_rows))
    return ((pl.cdiv(n_rows, n_blocks) + 7) // 8) * 8


def triangulation(doas, mic_itval=28):
    """doas: [N, T, n_avb_mics] float (degrees). Returns xy: [N, T, 2] f32."""
    doas = doas.astype(jnp.float32)
    if doas.shape[-1] == 4:
        d1 = doas[:, :, 0]
        d2 = doas[:, :, 3]        # torch.index_select(doas, -1, [0, 3])
    else:
        d1 = doas[:, :, 0]
        d2 = doas[:, :, 1]
    N, T = d1.shape

    # Global data-dependent branch; the reduction fuses with the channel
    # slice and only a (1, 1) scalar is handed to the kernel (SMEM).
    flag = jnp.any(d1 == d2).astype(jnp.float32).reshape(1, 1)

    # Free reshape: fold rows into lanes when T is small, otherwise use the
    # [N, T] planes directly (no pad/flatten staging pass).
    k = _fold_factor(N, T)
    rows, cols = N // k, k * T
    d1v = d1.reshape(rows, cols)
    d2v = d2.reshape(rows, cols)

    tile = _row_tile(rows, cols * 4)
    grid = (pl.cdiv(rows, tile),)        # ragged last block is bounds-clipped

    blk = pl.BlockSpec((tile, cols), lambda i: (i, 0))
    smem = pl.BlockSpec(memory_space=pltpu.MemorySpace.SMEM)

    x, y = pl.pallas_call(
        functools.partial(_tri_kernel, mic_itval=float(mic_itval)),
        out_shape=(
            jax.ShapeDtypeStruct((rows, cols), jnp.float32),
            jax.ShapeDtypeStruct((rows, cols), jnp.float32),
        ),
        grid=grid,
        in_specs=[smem, blk, blk],
        out_specs=(blk, blk),
        compiler_params=pltpu.CompilerParams(
            dimension_semantics=("parallel",),
            vmem_limit_bytes=48 * 1024 * 1024,
        ),
    )(flag, d1v, d2v)

    # TODO(synk): the final interleave to [N, T, 2] stays a wrapper-side stack;
    # writing the interleaved layout in-kernel would need a lane-interleaving
    # relayout / lane-width-2 stores that Mosaic does not lower efficiently.
    x = x.reshape(N, T)
    y = y.reshape(N, T)
    return jnp.stack((x, y), axis=2)


def _triangulation_ref(doas, mic_itval=28):
    """Pure-JAX reference mirroring the PyTorch forward exactly."""
    doas = doas.astype(jnp.float32)
    if doas.shape[-1] == 4:
        doas = doas[..., jnp.array([0, 3])]
    doa1 = doas[:, :, 0]
    doa2 = doas[:, :, 1]
    any_eq = jnp.any(doa1 == doa2)
    doa1 = jnp.where(any_eq, doa1 + 1.0, doa1)
    doa1 = doa1 / 180.0 * np.pi
    doa2 = doa2 / 180.0 * np.pi
    side = jnp.clip(
        jnp.sin(doa2) * mic_itval / (jnp.sin(doa1 - doa2) + 1e-8), 50.0, 800.0
    )
    x = -side * jnp.cos(doa1)
    y = side * jnp.sin(doa1)
    return jnp.stack((x, y), axis=2)


def _check(doas, mic_itval=28):
    xy = jax.block_until_ready(triangulation(doas, mic_itval=mic_itval))
    ref = _triangulation_ref(doas, mic_itval=mic_itval)
    assert xy.shape == ref.shape and xy.dtype == jnp.float32
    np.testing.assert_allclose(np.asarray(xy), np.asarray(ref), rtol=2e-3, atol=2e-2)


if __name__ == "__main__":
    key = jax.random.PRNGKey(0)

    # Small shape consistent with the forward: B=2, F=4 -> N=8, T=16, mics=4.
    doas = jax.random.uniform(
        key, (8, 16, 4), dtype=jnp.float32, minval=0.0, maxval=180.0
    )
    _check(doas)

    # Exercise the global (doa1 == doa2).any() branch (flag = 1).
    doas_eq = doas.at[0, 0, 3].set(doas[0, 0, 0])
    _check(doas_eq)

    # 2-mic path (no index_select branch).
    doas2 = jax.random.uniform(
        jax.random.PRNGKey(1), (8, 16, 2), dtype=jnp.float32, minval=0.0, maxval=180.0
    )
    _check(doas2)

    # Larger, odd-T shape: exercises the direct [N, T] path with a
    # multi-block parallel grid (2 blocks of (128, 2100)).
    doas_big = jax.random.uniform(
        jax.random.PRNGKey(2), (256, 2100, 4), dtype=jnp.float32, minval=0.0, maxval=180.0
    )
    _check(doas_big)

    print("KERNEL_OK")
</pallas_src>

<mosaic_0001>
module attributes {stable_mosaic.version = 11 : i64} {
  func.func @_tri_kernel(%arg0: i32, %arg1: memref<1x1xf32, #tpu.memory_space<smem>>, %arg2: memref<1x128xf32, #tpu.memory_space<vmem>>, %arg3: memref<1x128xf32, #tpu.memory_space<vmem>>, %arg4: memref<1x128xf32, #tpu.memory_space<vmem>>, %arg5: memref<1x128xf32, #tpu.memory_space<vmem>>) attributes {dimension_semantics = [#tpu.dimension_semantics<parallel>], iteration_bounds = array<i64: 1>, scalar_prefetch = 0 : i64, scratch_operands = 0 : i64, tpu.core_type = #tpu.core_type<tc>, window_params = [{transform_indices = @transform_0, window_bounds = array<i64: 1, 1>}, {transform_indices = @transform_1, window_bounds = array<i64: 1, 128>}, {transform_indices = @transform_2, window_bounds = array<i64: 1, 128>}, {transform_indices = @transform_3, window_bounds = array<i64: 1, 128>}, {transform_indices = @transform_4, window_bounds = array<i64: 1, 128>}]} {
    %c0 = arith.constant 0 : index
    %c0_0 = arith.constant 0 : index
    %0 = vector.load %arg2[%c0, %c0_0] : memref<1x128xf32, #tpu.memory_space<vmem>>, vector<1x128xf32>
    %c0_1 = arith.constant 0 : index
    %c0_2 = arith.constant 0 : index
    %1 = memref.load %arg1[%c0_1, %c0_2] : memref<1x1xf32, #tpu.memory_space<smem>>
    %2 = vector.broadcast %1 : f32 to vector<1x128xf32>
    %3 = arith.addf %0, %2 : vector<1x128xf32>
    %cst = arith.constant 0.0174532924 : f32
    %4 = vector.broadcast %cst : f32 to vector<1x128xf32>
    %5 = arith.mulf %3, %4 : vector<1x128xf32>
    %c0_3 = arith.constant 0 : index
    %c0_4 = arith.constant 0 : index
    %6 = vector.load %arg3[%c0_3, %c0_4] : memref<1x128xf32, #tpu.memory_space<vmem>>, vector<1x128xf32>
    %cst_5 = arith.constant 0.0174532924 : f32
    %7 = vector.broadcast %cst_5 : f32 to vector<1x128xf32>
    %8 = arith.mulf %6, %7 : vector<1x128xf32>
    %9 = math.sin %5 : vector<1x128xf32>
    %10 = math.cos %5 : vector<1x128xf32>
    %11 = math.sin %8 : vector<1x128xf32>
    %12 = math.cos %8 : vector<1x128xf32>
    %13 = arith.mulf %9, %12 : vector<1x128xf32>
    %14 = arith.mulf %10, %11 : vector<1x128xf32>
    %15 = arith.subf %13, %14 : vector<1x128xf32>
    %cst_6 = arith.constant 9.99999993E-9 : f32
    %16 = vector.broadcast %cst_6 : f32 to vector<1x128xf32>
    %17 = arith.addf %15, %16 : vector<1x128xf32>
    %cst_7 = arith.constant 2.800000e+01 : f32
    %18 = vector.broadcast %cst_7 : f32 to vector<1x128xf32>
    %19 = arith.mulf %11, %18 : vector<1x128xf32>
    %20 = arith.divf %19, %17 : vector<1x128xf32>
    %cst_8 = arith.constant 5.000000e+01 : f32
    %cst_9 = arith.constant 8.000000e+02 : f32
    %21 = vector.broadcast %cst_8 : f32 to vector<1x128xf32>
    %22 = arith.maximumf %21, %20 : vector<1x128xf32>
    %23 = vector.broadcast %cst_9 : f32 to vector<1x128xf32>
    %24 = arith.minimumf %23, %22 : vector<1x128xf32>
    %cst_10 = arith.constant 0.000000e+00 : f32
    %25 = vector.broadcast %cst_10 : f32 to vector<1x128xf32>
    %26 = arith.subf %25, %24 : vector<1x128xf32>
    %27 = arith.mulf %26, %10 : vector<1x128xf32>
    %c0_11 = arith.constant 0 : index
    %c0_12 = arith.constant 0 : index
    %28 = vector.load %arg4[%c0_11, %c0_12] : memref<1x128xf32, #tpu.memory_space<vmem>>, vector<1x128xf32>
    tpu.vector_store %arg4[%c0_11, %c0_12], %27 {strides = array<i32>} : memref<1x128xf32, #tpu.memory_space<vmem>>, vector<1x128xf32>,
    %29 = arith.mulf %24, %9 : vector<1x128xf32>
    %c0_13 = arith.constant 0 : index
    %c0_14 = arith.constant 0 : index
    %30 = vector.load %arg5[%c0_13, %c0_14] : memref<1x128xf32, #tpu.memory_space<vmem>>, vector<1x128xf32>
    tpu.vector_store %arg5[%c0_13, %c0_14], %29 {strides = array<i32>} : memref<1x128xf32, #tpu.memory_space<vmem>>, vector<1x128xf32>,
    return
  }
  func.func @transform_0(%arg0: i32) -> (i32, i32) {
    %c0_i32 = arith.constant 0 : i32
    %c0_i32_0 = arith.constant 0 : i32
    %c0_i32_1 = arith.constant 0 : i32
    return %c0_i32, %c0_i32_0 : i32, i32
  }
  func.func @transform_1(%arg0: i32) -> (i32, i32) {
    %c0_i32 = arith.constant 0 : i32
    %c0_i32_0 = arith.constant 0 : i32
    return %arg0, %c0_i32 : i32, i32
  }
  func.func @transform_2(%arg0: i32) -> (i32, i32) {
    %c0_i32 = arith.constant 0 : i32
    %c0_i32_0 = arith.constant 0 : i32
    return %arg0, %c0_i32 : i32, i32
  }
  func.func @transform_3(%arg0: i32) -> (i32, i32) {
    %c0_i32 = arith.constant 0 : i32
    %c0_i32_0 = arith.constant 0 : i32
    return %arg0, %c0_i32 : i32, i32
  }
  func.func @transform_4(%arg0: i32) -> (i32, i32) {
    %c0_i32 = arith.constant 0 : i32
    %c0_i32_0 = arith.constant 0 : i32
    return %arg0, %c0_i32 : i32, i32
  }
}

</mosaic_0001>

<bundles_post_ra>
// kernel: tpu_custom_call.1
= control target key start
LH: loop header
LB: loop body
LE: loop exit
PB: predicated region body
PF: predicated region fallthrough
CT: control target
= control target key end

     0   :  { %11 = vsyncpa [#allocation4], 0  ;;  %s706_s0 = inlined_call_operand.<no memory space> [shape: f32[1,1], index: 0, kind: input, shape index: {}]   ;;  %s707_s1 = inlined_call_operand.vmem [shape: f32[1,128], index: 1, kind: input, shape index: {}]   ;;  %s708_s2 = inlined_call_operand.vmem [shape: f32[1,128], index: 2, kind: input, shape index: {}]   ;;  %s709_s3 = inlined_call_operand.hbm [shape: f32[1,128], index: 3, kind: output, shape index: {0}]   ;;  %s710_s4 = inlined_call_operand.hbm [shape: f32[1,128], index: 4, kind: output, shape index: {1}]  }
   0x1   :  { %v19_v0 = vld [vmem:[%s707_s1] sm:$0x1]  ;;  %v21_v1 = vstv %s706_s0 }
   0x2   :  { %v24_v2 = vld [vmem:[%s708_s2] sm:$0x1]  ;;  %v22_v3 = vadd.f32 %v21_v1, %v19_v0 }
   0x3   :  { %v610_v4 = vmul.f32 0.017453292, %v24_v2 }
   0x4   :  { %v612_v5 = vmul.f32 0.017453292, %v22_v3 }
   0x5   :  { %v236_v6 = vand.u32 2139095040, %v610_v4 }
   0x6   :  { %12 = vsyncpa [#allocation6], 0  ;;  %v26_v7 = vand.u32 2147483647, %v612_v5  ;;  %v29_v8 = vand.u32 2139095040, %v612_v5  ;;  %vm28_vm14 = vcmp.lt.s32.totalorder %v612_v5, 0 }
   0x7   :  { %v237_v9 = vshrl.u32 %v236_v6, 23  ;;  %v233_v12 = vand.u32 2147483647, %v610_v4  ;;  %v568_v28 = vmov 683565275   ;;  %s574_s0 = smov [#allocation5]  }
   0x8   :  { %v30_v10 = vshrl.u32 %v29_v8, 23  ;;  %v33_v11 = vand.u32 8388607, %v26_v7  ;;  %v569_v30 = vmov 2475754826   ;;  %s470_s1 = sshll.u32 %s574_s0, 4  ;;  %s471_s1 = int_to_ptr.vmem [resolvable:$true] %s470_s1 }
   0x9   :  { %v490_v13 = vadd.s32 4294967169, %v237_v9  ;;  %v622_v18 = vand.u32 8388607, %v233_v12  ;;  %v570_v35 = vmov 2131351028   ;;  %s575_s2 = smov [#allocation3]   ;;  %p529_p1 = scmp.lt.s32.totalorder %s471_s1, %s471_s1 }
   0xa   :  { %v482_v14 = vadd.s32 4294967169, %v30_v10  ;;  %v34_v16 = vor.u32 8388608, %v33_v11  ;;  %v571_v37 = vmov 2102212464   ;;  %v572_v39 = vmov 920167782  }
   0xb   :  { %v243_v15 = vadd.s32 1, %v490_v13  ;;  %v241_v25 = vor.u32 8388608, %v622_v18  ;;  %v573_v47 = vmov 1326507024   ;;  %vm680_vm15 = vcmp.le.f32.partialorder %v26_v7, 0.7853982 }
   0xc   :  { %v36_v17 = vadd.s32 1, %v482_v14  ;;  %v624_v24 = vshll.u32 %v34_v16, 8  ;;  %s460_s21 = sshll.u32 %s575_s2, 4  ;;  %s524_s22 = scalar_lea.vmem %s471_s1, 16  ;;  %s461_s21 = int_to_ptr.vmem [resolvable:$true] %s460_s21 }
   0xd   :  { %vm244_vm0 = vcmp.gt.s32.totalorder %v243_v15, 0  ;;  %p525_p0 = scmp.ne.s32.totalorder %s471_s1, %s524_s22  ;;  %s528_s23 = scalar_lea.vmem %s471_s1, 32 }
   0xe   :  { %vm37_vm1 = vcmp.gt.s32.totalorder %v36_v17, 0  ;;  %v245_v19 = vsel %vm244_vm0, %v243_v15, 0  ;;  %vm235_vm0 = vcmp.lt.s32.totalorder %v610_v4, 0  ;;  %p530_p2 = scmp.lt.s32.totalorder %s528_s23, %s524_s22 }
   0xf   :  { %v38_v20 = vsel %vm37_vm1, %v36_v17, 0  ;;  %v247_v21 = vand.u32 31, %v245_v19  ;;  %v627_v26 = vshrl.u32 %v245_v19, 5  ;;  %vm234_vm1 = vcmp.le.f32.partialorder %v233_v12, 0.7853982 }
  0x10   :  { %v39_v22 = vshrl.u32 %v38_v20, 5  ;;  %v40_v23 = vand.u32 31, %v38_v20  ;;  %p531_p3 = por %p530_p2, %p529_p1 }
  0x11   :  { %v248_v27 = vsub.s32 32, %v247_v21  ;;  %v250_v29 = vshll.u32 %v568_v28, %v247_v21  ;;  %v253_v31 = vshll.u32 %v569_v30, %v247_v21  ;;  %v256_v41 = vshll.u32 %v570_v35, %v247_v21 }
  0x12   :  { %v41_v32 = vsub.s32 32, %v40_v23  ;;  %v43_v33 = vshll.u32 %v568_v28, %v40_v23  ;;  %v46_v34 = vshll.u32 %v569_v30, %v40_v23  ;;  %v49_v36 = vshll.u32 %v570_v35, %v40_v23  ;;  %p532_p4 = pnand %p531_p3, %p525_p0 }
  0x13   :  { %v52_v38 = vshll.u32 %v571_v37, %v40_v23  ;;  %v55_v40 = vshll.u32 %v572_v39, %v40_v23  ;;  %vm58_vm2 = vcmp.lt.s32.totalorder %v39_v22, 1  ;;  %vm59_vm3 = vcmp.lt.s32.totalorder %v39_v22, 2 }
  0x14   :  { %v42_v42 = vshrl.u32 %v568_v28, %v41_v32  ;;  %v44_v43 = vshrl.u32 %v569_v30, %v41_v32  ;;  %v47_v44 = vshrl.u32 %v570_v35, %v41_v32  ;;  %v50_v45 = vshrl.u32 %v571_v37, %v41_v32 }
  0x15   :  { %v53_v46 = vshrl.u32 %v572_v39, %v41_v32  ;;  %v56_v48 = vshrl.u32 %v573_v47, %v41_v32  ;;  %vm60_vm4 = vcmp.lt.s32.totalorder %v39_v22, 3  ;;  %vm61_vm5 = vcmp.lt.s32.totalorder %v39_v22, 4 }
  0x16   :  { %v45_v49 = vor.u32 %v44_v43, %v43_v33  ;;  %v48_v50 = vor.u32 %v47_v44, %v46_v34  ;;  %v51_v51 = vor.u32 %v50_v45, %v49_v36  ;;  %v251_v54 = vshrl.u32 %v569_v30, %v248_v27 }
  0x17   :  { %v54_v52 = vor.u32 %v53_v46, %v52_v38  ;;  %v57_v53 = vor.u32 %v56_v48, %v55_v40  ;;  %v254_v55 = vshrl.u32 %v570_v35, %v248_v27  ;;  %v249_v63 = vshrl.u32 %v568_v28, %v248_v27 }
  0x18   :  { %v62_v56 = vsel %vm58_vm2, %v42_v42, %v45_v49  ;;  %v63_v57 = vsel %vm61_vm5, %v51_v51, 2102212464  ;;  %v66_v58 = vsel %vm58_vm2, %v45_v49, %v48_v50  ;;  %v70_v59 = vsel %vm58_vm2, %v48_v50, %v51_v51 }
  0x19   :  { %v64_v60 = vsel %vm60_vm4, %v48_v50, %v63_v57  ;;  %v67_v61 = vsel %vm61_vm5, %v54_v52, 920167782  ;;  %v71_v62 = vsel %vm61_vm5, %v57_v53, 1326507024  ;;  %v252_v3 = vor.u32 %v251_v54, %v250_v29 }
  0x1a   :  { %v65_v0 = vsel %vm59_vm3, %v62_v56, %v64_v60  ;;  %v68_v1 = vsel %vm60_vm4, %v51_v51, %v67_v61  ;;  %v72_v2 = vsel %vm60_vm4, %v54_v52, %v71_v62  ;;  %v255_v9 = vor.u32 %v254_v55, %v253_v31 }
  0x1b   :  { %v69_v6 = vsel %vm59_vm3, %v66_v58, %v68_v1  ;;  %v73_v8 = vsel %vm59_vm3, %v70_v59, %v72_v2  ;;  %v257_v10 = vshrl.u32 %v571_v37, %v248_v27  ;;  %v259_v17 = vshll.u32 %v571_v37, %v247_v21 }
  0x1c   :  { %v639_v11 = vmul.u32.u64.low %v624_v24, %v73_v8  ;;  %v640_v13 = vmul.u32.u64.high %v624_v24, %v73_v8, %v639_v11  ;;  %v643_v14 = vmul.u32.u64.low %v624_v24, %v69_v6  ;;  %v644_v15 = vmul.u32.u64.high %v624_v24, %v69_v6, %v643_v14 }
  0x1d   :  { %v258_v16 = vor.u32 %v257_v10, %v256_v41  ;;  %v260_v18 = vshrl.u32 %v572_v39, %v248_v27  ;;  %v262_v19 = vshll.u32 %v572_v39, %v247_v21  ;;  %v81_v20 = vmul.u32 %v624_v24, %v65_v0 }
  0x1e   :  { %v263_v23 = vshrl.u32 %v573_v47, %v248_v27  ;;  %vm265_vm6 = vcmp.lt.s32.totalorder %v627_v26, 1  ;;  %v281_v22 = vshll.u32 %v241_v25, 8  ;;  %vm266_vm7 = vcmp.lt.s32.totalorder %v627_v26, 2 }
  0x1f   :  { %v261_v28 = vor.u32 %v260_v18, %v259_v17  ;;  %vm267_vm8 = vcmp.lt.s32.totalorder %v627_v26, 3  ;;  %vm268_vm9 = vcmp.lt.s32.totalorder %v627_v26, 4  ;;  %vm83_vm10 = vc.u32 %v640_v13, %v643_v14 }
  0x20   :  { %v84_v29 = vadd.s32 1, %v644_v15  ;;  %v264_v30 = vor.u32 %v263_v23, %v262_v19  ;;  %v273_v31 = vsel %vm265_vm6, %v252_v3, %v255_v9  ;;  %v269_v21 = vsel %vm265_vm6, %v249_v63, %v252_v3 }
  0x21   :  { %v270_v32 = vsel %vm268_vm9, %v258_v16, 2102212464  ;;  %v274_v24 = vsel %vm268_vm9, %v261_v28, 920167782  ;;  %v277_v27 = vsel %vm265_vm6, %v255_v9, %v258_v16  ;;  %v82_v60 = vadd.s32 %v643_v14, %v640_v13 }
  0x22   :  { %v85_v33 = vsel %vm83_vm10, %v84_v29, %v644_v15  ;;  %v271_v25 = vsel %vm267_vm8, %v255_v9, %v270_v32  ;;  %v275_v34 = vsel %vm267_vm8, %v258_v16, %v274_v24  ;;  %v278_v35 = vsel %vm268_vm9, %v264_v30, 1326507024 }
  0x23   :  { %v86_v36 = vadd.s32 %v85_v33, %v81_v20  ;;  %v276_v37 = vsel %vm266_vm7, %v273_v31, %v275_v34  ;;  %v279_v38 = vsel %vm267_vm8, %v261_v28, %v278_v35  ;;  %v272_v39 = vsel %vm266_vm7, %v269_v21, %v271_v25 }
  0x24   :  { %v280_v40 = vsel %vm266_vm7, %v277_v27, %v279_v38  ;;  %v666_v41 = vmul.u32.u64.low %v281_v22, %v276_v37  ;;  %v667_v42 = vmul.u32.u64.high %v281_v22, %v276_v37, %v666_v41  ;;  %v288_v47 = vmul.u32 %v281_v22, %v272_v39 }
  0x25   :  { %v87_v43 = vadd.s32 536870912, %v86_v36  ;;  %v669_v44 = vmul.u32.u64.low %v281_v22, %v280_v40  ;;  %v670_v45 = vmul.u32.u64.high %v281_v22, %v280_v40, %v669_v44  ;;  %vm118_vm8 = vweird.f32 %v612_v5 }
  0x26   :  { %v291_v48 = vadd.s32 1, %v667_v42 }
  0x27   :  { %v88_v46 = vshrl.u32 %v87_v43, 30  ;;  %vm290_vm11 = vc.u32 %v670_v45, %v666_v41  ;;  %v289_v17 = vadd.s32 %v666_v41, %v670_v45 }
  0x28   :  { %v292_v50 = vsel %vm290_vm11, %v291_v48, %v667_v42 }
  0x29   :  { %v89_v49 = vshll.u32 %v88_v46, 30  ;;  %v293_v52 = vadd.s32 %v292_v50, %v288_v47  ;;  %v112_v24 = vsub.s32 4, %v88_v46 }
  0x2b   :  { %v90_v51 = vsub.s32 %v86_v36, %v89_v49  ;;  %v294_v53 = vadd.s32 536870912, %v293_v52  ;;  %v113_v35 = vsel %vm28_vm14, %v112_v24, %v88_v46 }
  0x2c   :  { %v115_v38 = vsel %vm680_vm15, 0, %v113_v35 }
  0x2d   :  { %v92_v26 = vsub.s32 0, %v90_v51  ;;  %v295_v55 = vshrl.u32 %v294_v53, 30  ;;  %v119_v42 = vadd.s32 3, %v115_v38  ;;  %v223_v46 = vand.u32 3, %v115_v38 }
  0x2f   :  { %v483_v54 = vmin.u32 %v92_v26, %v90_v51  ;;  %v296_v57 = vshll.u32 %v295_v55, 30  ;;  %v319_v7 = vsub.s32 4, %v295_v55  ;;  %v120_v45 = vand.u32 3, %v119_v42 }
  0x30   :  { %vm225_vm4 = vcmp.eq.s32.totalorder %v223_v46, 0  ;;  %vm228_vm5 = vcmp.eq.s32.totalorder %v223_v46, 2  ;;  %vm224_vm7 = vcmp.lt.s32.totalorder %v223_v46, 2 }
  0x31   :  { %v94_v56 = vclz %v483_v54  ;;  %v297_v59 = vsub.s32 %v293_v52, %v296_v57  ;;  %v320_v40 = vsel %vm235_vm0, %v319_v7, %v295_v55  ;;  %vm122_vm2 = vcmp.eq.s32.totalorder %v120_v45, 0 }
  0x32   :  { %v322_v43 = vsel %vm234_vm1, 0, %v320_v40  ;;  %vm125_vm3 = vcmp.eq.s32.totalorder %v120_v45, 2  ;;  %vm121_vm6 = vcmp.lt.s32.totalorder %v120_v45, 2 }
  0x33   :  { %v484_v58 = vadd.s32 4294967294, %v94_v56  ;;  %v299_v62 = vsub.s32 0, %v297_v59  ;;  %v326_v48 = vadd.s32 3, %v322_v43 }
  0x35   :  { %vm485_vm12 = vcmp.lt.s32.totalorder %v484_v58, 0  ;;  %v491_v2 = vmin.u32 %v299_v62, %v297_v59  ;;  %v327_v12 = vand.u32 3, %v326_v48 }
  0x36   :  { %v97_v61 = vsel %vm485_vm12, 0, %v484_v58 }
  0x37   :  { %v98_v63 = vsub.s32 32, %v97_v61  ;;  %v99_v0 = vshll.u32 %v90_v51, %v97_v61  ;;  %v102_v1 = vsub.s32 4294967266, %v97_v61  ;;  %v301_v8 = vclz %v491_v2 }
  0x38   :  { %v430_v51 = vand.u32 3, %v322_v43  ;;  %vm332_vm9 = vcmp.eq.s32.totalorder %v327_v12, 2  ;;  %vm329_vm12 = vcmp.eq.s32.totalorder %v327_v12, 0 }
  0x39   :  { %v100_v3 = vshrl.u32 %v82_v60, %v98_v63  ;;  %v103_v6 = vadd.s32 127, %v102_v1  ;;  %v492_v11 = vadd.s32 4294967294, %v301_v8 }
  0x3a   :  { %vm432_vm10 = vcmp.eq.s32.totalorder %v430_v51, 0  ;;  %vm435_vm11 = vcmp.eq.s32.totalorder %v430_v51, 2 }
  0x3b   :  { %v101_v9 = vor.u32 %v100_v3, %v99_v0  ;;  %v104_v10 = vshll.u32 %v103_v6, 23  ;;  %vm493_vm13 = vcmp.lt.s32.totalorder %v492_v11, 0 }
  0x3c   :  { %v304_v13 = vsel %vm493_vm13, 0, %v492_v11  ;;  %vm328_vm13 = vcmp.lt.s32.totalorder %v327_v12, 2 }
  0x3d   :  { %v105_v15 = vor.u32 4788187, %v104_v10  ;;  %v108_v16 = vcvt.s32.f32 %v101_v9  ;;  %v305_v14 = vsub.s32 32, %v304_v13  ;;  %v306_v19 = vshll.u32 %v297_v59, %v304_v13 }
  0x3e   :  { %v309_v20 = vsub.s32 4294967266, %v304_v13 }
  0x3f   :  { %v106_v18 = vand.u32 2147483647, %v105_v15  ;;  %v307_v22 = vshrl.u32 %v289_v17, %v305_v14 }
  0x40   :  { %v310_v28 = vadd.s32 127, %v309_v20 }
  0x41   :  { %v109_v23 = vmul.f32 %v108_v16, %v106_v18  ;;  %v308_v31 = vor.u32 %v307_v22, %v306_v19 }
  0x42   :  { %v311_v21 = vshll.u32 %v310_v28, 23 }
  0x43   :  { %v110_v30 = vxor.u32 2147483648, %v109_v23  ;;  %v315_v25 = vcvt.s32.f32 %v308_v31 }
  0x44   :  { %v312_v33 = vor.u32 4788187, %v311_v21 }
  0x45   :  { %v111_v32 = vsel %vm28_vm14, %v110_v30, %v109_v23  ;;  %vm431_vm14 = vcmp.lt.s32.totalorder %v430_v51, 2 }
  0x46   :  { %v114_v27 = vsel %vm680_vm15, %v612_v5, %v111_v32  ;;  %v313_v34 = vand.u32 2147483647, %v312_v33  ;;  %vm325_vm15 = vweird.f32 %v610_v4 }
  0x47   :  { %514 = vcosq.f32 %v114_v27 }
  0x48   :  { %516 = vsinq.f32 %v114_v27  ;;  %v316_v36 = vmul.f32 %v315_v25, %v313_v34 }
  0x4a   :  { %v317_v37 = vxor.u32 2147483648, %v316_v36 }
  0x4c   :  { %v318_v39 = vsel %vm235_vm0, %v317_v37, %v316_v36 }
  0x4d   :  { %v321_v41 = vsel %vm234_vm1, %v610_v4, %v318_v39 }
  0x4e   :  { %518 = vcosq.f32 %v321_v41 }
  0x4f   :  { %520 = vsinq.f32 %v321_v41 }
  0x54   :  { %v515_v44 = vpop.eup %514 }
  0x55   :  { %v517_v47 = vpop.eup %516  ;;  %v126_v50 = vxor.u32 2147483648, %v515_v44 }
  0x56   :  { %v123_v49 = vxor.u32 2147483648, %v517_v47 }
  0x57   :  { %v127_v26 = vsel %vm125_vm3, %v126_v50, %v517_v47  ;;  %v230_v54 = vsel %vm228_vm5, %v126_v50, %v517_v47 }
  0x58   :  { %v124_v52 = vsel %vm122_vm2, %v515_v44, %v123_v49  ;;  %v227_v53 = vsel %vm225_vm4, %v515_v44, %v123_v49 }
  0x59   :  { %v128_v57 = vsel %vm121_vm6, %v124_v52, %v127_v26  ;;  %v231_v58 = vsel %vm224_vm7, %v227_v53, %v230_v54 }
  0x5a   :  { %v129_v63 = vsel %vm118_vm8, nan, %v128_v57  ;;  %v232_v0 = vsel %vm118_vm8, nan, %v231_v58 }
  0x5b   :  { %v519_v55 = vpop.eup %518 }
  0x5c   :  { %v521_v56 = vpop.eup %520  ;;  %v333_v59 = vxor.u32 2147483648, %v519_v55 }
  0x5d   :  { %v330_v60 = vxor.u32 2147483648, %v521_v56 }
  0x5e   :  { %v334_v61 = vsel %vm332_vm9, %v333_v59, %v521_v56  ;;  %v437_v62 = vsel %vm435_vm11, %v333_v59, %v521_v56 }
  0x5f   :  { %v331_v1 = vsel %vm329_vm12, %v519_v55, %v330_v60  ;;  %v434_v2 = vsel %vm432_vm10, %v519_v55, %v330_v60 }
  0x60   :  { %v335_v3 = vsel %vm328_vm13, %v331_v1, %v334_v61  ;;  %v438_v6 = vsel %vm431_vm14, %v434_v2, %v437_v62 }
  0x61   :  { %v336_v8 = vsel %vm325_vm15, nan, %v335_v3  ;;  %v439_v9 = vsel %vm325_vm15, nan, %v438_v6 }
  0x62   :  { %v440_v10 = vmul.f32 %v439_v9, %v129_v63  ;;  %v441_v11 = vmul.f32 %v336_v8, %v232_v0  ;;  %v444_v4 = vmul.f32 28.0, %v336_v8 }
  0x64   :  { %v442_v15 = vsub.f32 %v440_v10, %v441_v11 }
  0x66   :  { %v443_v16 = vadd.f32 1e-08, %v442_v15 }
  0x68   :  { %522 = vrcp.f32 %v443_v16 }
  0x75   :  { %v523_v17 = vpop.eup %522 }
  0x76   :  { %v446_v18 = vmul.f32 %v523_v17, %v444_v4 }
  0x78   :  { %v447_v13 = vmax.f32 %v446_v18, 50.0 }
  0x7a   :  { %v448_v5 = vmin.f32 %v447_v13, 800.0 }
  0x7c   :  { %v449_v14 = vsub.f32 0.0, %v448_v5  ;;  %v452_v19 = vmul.f32 %v448_v5, %v129_v63 }
  0x7e   :  { %v450_v20 = vmul.f32 %v449_v14, %v232_v0  ;;  %453 = vst [vmem:[#allocation5] sm:$0x1] %v452_v19 }
  0x7f   :  { %535 = shalt.err (!%p532_p4)
}
  0x80   :  { %473 = dma.vmem_to_hbm [thread:$0]  %s471_s1, 16, %s710_s4, [#allocation6]   ;;  %451 = vst [vmem:[#allocation3] sm:$0x1] %v450_v20 }
  0x81   :  { %s544_s26 = scalar_lea.vmem %s461_s21, 16  ;;  %s548_s27 = scalar_lea.vmem %s461_s21, 32 }
  0x82   :  { %p545_p5 = scmp.ne.s32.totalorder %s461_s21, %s544_s26  ;;  %p549_p6 = scmp.lt.s32.totalorder %s461_s21, %s461_s21 }
  0x83   :  { %p550_p7 = scmp.lt.s32.totalorder %s548_s27, %s544_s26 }
  0x85   :  { %p551_p8 = por %p550_p7, %p549_p6 }
  0x87   :  { %p552_p9 = pnand %p551_p8, %p545_p5 }
  0x89   :  { %555 = shalt.err (!%p552_p9)
}
  0x8a   :  { %463 = dma.vmem_to_hbm [thread:$0]  %s461_s21, 16, %s709_s3, [#allocation4]  }
  0x8b   :  { %564 = dma.done.wait [#allocation4], 16  }
  0x8c   :  { %565 = vsyncadd [#allocation4], 4294967280 }
  0x8d   :  { %566 = dma.done.wait [#allocation6], 16  }
  0x8e   :  { %567 = vsyncadd [#allocation6], 4294967280 }
  0x8f   :  { %480 = vsyncpa [#allocation4], 1 }
  0x90   :  { %481 = vsyncpa [#allocation6], 1 }

</bundles_post_ra>
